<compile_context>
chip_gen: v6e
topology: v6e:2x2x1
jax: 0.10.0
libtpu: 0.0.40
codegen_flags: <defaults>
</compile_context>

<pallas_src>
import math

import jax
import jax.numpy as jnp
from jax import lax
from jax.experimental import pallas as pl
from jax.experimental.pallas import tpu as pltpu

_INV_SQRT2 = 0.7071067811865476


def _token_output_kernel(x_ref, w_ref, b_ref, o_ref):
    # x_ref: (TB, E) VMEM tile of cls_tok
    # w_ref: (2, E)  VMEM, resident across grid steps (PyTorch-native layout)
    # b_ref: (2, 1)  VMEM bias
    # o_ref: (2, TB) VMEM output tile (lane-dense: batch on the 128-lane axis)
    x = x_ref[...]
    w = w_ref[...]

    # logits^T = w @ x^T  -> (2, TB), f32 accumulation on the MXU (NT dimension numbers).
    lt = lax.dot_general(
        w, x, (((1,), (1,)), ((), ())), preferred_element_type=jnp.float32
    )
    lt = lt + b_ref[...]  # (2, 1) broadcast over lanes

    # Exact GELU (PyTorch nn.GELU() default), computed ONCE, lane-dense.
    g = 0.5 * lt * (1.0 + lax.erf(lt * _INV_SQRT2))

    # 2-class softmax over the class axis in closed form, full relative precision.
    d = g[0:1, :] - g[1:2, :]                  # (1, TB)
    d2 = jnp.concatenate([d, -d], axis=0)      # (2, TB)
    o_ref[...] = jax.nn.sigmoid(d2)            # p0 = sigmoid(d), p1 = sigmoid(-d)


def _hw_vmem_bytes():
    try:
        return int(pltpu.get_tpu_info().vmem_capacity_bytes)
    except Exception:
        return 64 * 1024 * 1024  # conservative (v7x-sized) fallback


def _round_up(x, m):
    return ((x + m - 1) // m) * m


def _choose_tile_and_vmem(batch, embed_dim, itemsize):
    """Pick the batch tile TB and a computed vmem_limit_bytes."""
    vmem_cap = _hw_vmem_bytes()
    small_vmem = vmem_cap <= 96 * 1024 * 1024  # v7x (64 MiB/TC) vs v5e/v6e (128 MiB)

    # Double-buffered x slab budget (bytes).
    x_budget = (24 if small_vmem else 40) * 1024 * 1024
    row_bytes = max(1, embed_dim * itemsize)
    tb = x_budget // (2 * row_bytes)
    # 128-row granularity: multiple of 128 satisfies both the (tb, E) sublane rule
    # (incl. bf16 sublane packing) and the lane-dense (2, tb) output block rule.
    tb = max(128, (tb // 128) * 128)

    if small_vmem and batch >= 2 * 128:
        # Keep >=2 grid steps so the "parallel" grid axis can shard across v7x's 2 TCs.
        tb = min(tb, max(128, ((batch // 2) // 128) * 128))

    if batch <= tb:
        tb = batch  # full-extent block is always legal

    # Actual VMEM footprint: double-buffered x, padded resident weight, out, bias, margin.
    x_bytes = 2 * tb * embed_dim * itemsize
    w_bytes = 2 * 8 * _round_up(embed_dim, 128) * itemsize
    out_bytes = 2 * 8 * _round_up(max(tb, 128), 128) * 4
    need = x_bytes + w_bytes + out_bytes + 2 * 1024 * 1024

    cap_limit = (32 if small_vmem else 64) * 1024 * 1024
    vmem_limit = min(cap_limit, max(need, 16 * 1024 * 1024))
    return tb, int(vmem_limit)


def token_output(cls_tok, weight, bias):
    """cls_tok: (B, E) f32/bf16; weight: (2, E); bias: (2,)  ->  (B, 2) f32."""
    B, E = cls_tok.shape
    assert weight.shape == (2, E)

    w = weight.astype(cls_tok.dtype)            # bf16 path: real bf16 MXU matmul
    b = bias.astype(jnp.float32).reshape(2, 1)  # bias add always in f32

    tb, vmem_limit = _choose_tile_and_vmem(B, E, cls_tok.dtype.itemsize)
    grid = (pl.cdiv(B, tb),)

    out_t = pl.pallas_call(
        _token_output_kernel,
        out_shape=jax.ShapeDtypeStruct((2, B), jnp.float32),
        grid=grid,
        in_specs=[
            pl.BlockSpec((tb, E), lambda i: (i, 0)),   # x: streamed over batch
            pl.BlockSpec((2, E), lambda i: (0, 0)),    # weight: VMEM-resident
            pl.BlockSpec((2, 1), lambda i: (0, 0)),    # bias: tiny resident block
        ],
        out_specs=pl.BlockSpec((2, tb), lambda i: (0, i)),  # lane-dense output slab
        compiler_params=pltpu.CompilerParams(
            dimension_semantics=("parallel",),
            vmem_limit_bytes=vmem_limit,
        ),
    )(cls_tok, w, b)

    # Tiny (2, B) -> (B, 2) layout fixup outside the kernel (8*B bytes).
    return out_t.T


class TokenOutputPallas:
    """Mirror of the PyTorch TokenOutput module with deterministic init."""

    def __init__(self, embed_dim, key):
        k_w, k_b = jax.random.split(key)
        # nn.Linear default init: U(-1/sqrt(fan_in), 1/sqrt(fan_in)); weight is (out, in) = (2, E).
        bound = 1.0 / math.sqrt(embed_dim)
        self.weight = jax.random.uniform(
            k_w, (2, embed_dim), jnp.float32, minval=-bound, maxval=bound
        )
        self.bias = jax.random.uniform(
            k_b, (2,), jnp.float32, minval=-bound, maxval=bound
        )
        self.last_input = None

    def __call__(self, enc_out):
        cls_tok, phenos, seq_out = enc_out
        self.last_input = cls_tok
        return token_output(cls_tok, self.weight, self.bias)


if __name__ == "__main__":
    key = jax.random.PRNGKey(0)
    k_params, k_cls, k_phen, k_seq = jax.random.split(key, 4)

    batch = 8
    embed_dim = 32
    seq_len = 8

    module = TokenOutputPallas(embed_dim, k_params)

    cls_tok = jax.random.normal(k_cls, (batch, embed_dim), jnp.float32)
    phenos = jax.random.normal(k_phen, (batch, 4), jnp.float32)                   # unused, as in torch
    seq_out = jax.random.normal(k_seq, (batch, seq_len, embed_dim), jnp.float32)  # unused, as in torch

    out = module((cls_tok, phenos, seq_out))
    out = jax.block_until_ready(out)

    # Reference in plain JAX (exact GELU + softmax over axis 1), weight stored (2, E).
    logits = cls_tok @ module.weight.T + module.bias
    g = 0.5 * logits * (1.0 + lax.erf(logits / math.sqrt(2.0)))
    ref = jax.nn.softmax(g, axis=1)

    assert out.shape == (batch, 2)
    assert jnp.allclose(out, ref, atol=1e-5, rtol=1e-5)
    assert jnp.allclose(jnp.sum(out, axis=1), jnp.ones((batch,)), atol=1e-6)

    # bf16 input path (weight cast inside the wrapper, f32 accumulation).
    out_bf16 = token_output(cls_tok.astype(jnp.bfloat16), module.weight, module.bias)
    out_bf16 = jax.block_until_ready(out_bf16)
    assert out_bf16.shape == (batch, 2)
    assert jnp.allclose(out_bf16, ref, atol=3e-2)
    assert jnp.allclose(jnp.sum(out_bf16, axis=1), jnp.ones((batch,)), atol=1e-5)

    print("KERNEL_OK")
</pallas_src>

<mosaic_0001>
module attributes {stable_mosaic.version = 11 : i64} {
  func.func @_token_output_kernel(%arg0: i32, %arg1: memref<8x32xf32, #tpu.memory_space<vmem>>, %arg2: memref<2x32xf32, #tpu.memory_space<vmem>>, %arg3: memref<2x1xf32, #tpu.memory_space<vmem>>, %arg4: memref<2x8xf32, #tpu.memory_space<vmem>>) attributes {dimension_semantics = [#tpu.dimension_semantics<parallel>], iteration_bounds = array<i64: 1>, scalar_prefetch = 0 : i64, scratch_operands = 0 : i64, tpu.core_type = #tpu.core_type<tc>, window_params = [{transform_indices = @transform_0, window_bounds = array<i64: 8, 32>}, {pipeline_mode = #tpu.pipeline_mode<synchronous>, transform_indices = @transform_1, window_bounds = array<i64: 2, 32>}, {pipeline_mode = #tpu.pipeline_mode<synchronous>, transform_indices = @transform_2, window_bounds = array<i64: 2, 1>}, {transform_indices = @transform_3, window_bounds = array<i64: 2, 8>}]} {
    %c0 = arith.constant 0 : index
    %c0_0 = arith.constant 0 : index
    %0 = vector.load %arg1[%c0, %c0_0] : memref<8x32xf32, #tpu.memory_space<vmem>>, vector<8x32xf32>
    %c0_1 = arith.constant 0 : index
    %c0_2 = arith.constant 0 : index
    %1 = vector.load %arg2[%c0_1, %c0_2] : memref<2x32xf32, #tpu.memory_space<vmem>>, vector<2x32xf32>
    %cst = arith.constant dense<0.000000e+00> : vector<2x8xf32>
    %2 = tpu.matmul %1, %0, %cst {dimension_numbers = #tpu.dot_dimension_numbers<[1], [1], [0], [0], [0, 0, 1, 0], [], []>} : vector<2x32xf32>, vector<8x32xf32>, vector<2x8xf32> -> vector<2x8xf32>
    %c0_3 = arith.constant 0 : index
    %c0_4 = arith.constant 0 : index
    %3 = vector.load %arg3[%c0_3, %c0_4] : memref<2x1xf32, #tpu.memory_space<vmem>>, vector<2x1xf32>
    %4 = vector.broadcast %3 : vector<2x1xf32> to vector<2x8xf32>
    %5 = arith.addf %2, %4 : vector<2x8xf32>
    %cst_5 = arith.constant 5.000000e-01 : f32
    %6 = vector.broadcast %cst_5 : f32 to vector<2x8xf32>
    %7 = arith.mulf %6, %5 : vector<2x8xf32>
    %cst_6 = arith.constant 0.707106769 : f32
    %8 = vector.broadcast %cst_6 : f32 to vector<2x8xf32>
    %9 = arith.mulf %5, %8 : vector<2x8xf32>
    %10 = math.erf %9 : vector<2x8xf32>
    %cst_7 = arith.constant 1.000000e+00 : f32
    %11 = vector.broadcast %cst_7 : f32 to vector<2x8xf32>
    %12 = arith.addf %11, %10 : vector<2x8xf32>
    %13 = arith.mulf %7, %12 : vector<2x8xf32>
    %14 = vector.extract_strided_slice %13 {offsets = [0, 0], sizes = [1, 8], strides = [1, 1]} : vector<2x8xf32> to vector<1x8xf32>
    %15 = vector.extract_strided_slice %13 {offsets = [1, 0], sizes = [1, 8], strides = [1, 1]} : vector<2x8xf32> to vector<1x8xf32>
    %16 = arith.subf %14, %15 : vector<1x8xf32>
    %cst_8 = arith.constant 0.000000e+00 : f32
    %17 = vector.broadcast %cst_8 : f32 to vector<1x8xf32>
    %18 = arith.subf %17, %16 : vector<1x8xf32>
    %19 = tpu.concatenate %16, %18 in 0 : vector<1x8xf32>, vector<1x8xf32> -> vector<2x8xf32>
    %20 = arith.negf %19 : vector<2x8xf32>
    %21 = math.exp %20 : vector<2x8xf32>
    %cst_9 = arith.constant 1.000000e+00 : f32
    %22 = vector.broadcast %cst_9 : f32 to vector<2x8xf32>
    %23 = arith.addf %22, %21 : vector<2x8xf32>
    %24 = arith.divf %22, %23 : vector<2x8xf32>
    %c0_10 = arith.constant 0 : index
    %c0_11 = arith.constant 0 : index
    %25 = vector.load %arg4[%c0_10, %c0_11] : memref<2x8xf32, #tpu.memory_space<vmem>>, vector<2x8xf32>
    tpu.vector_store %arg4[%c0_10, %c0_11], %24 {strides = array<i32>} : memref<2x8xf32, #tpu.memory_space<vmem>>, vector<2x8xf32>,
    return
  }
  func.func @transform_0(%arg0: i32) -> (i32, i32) {
    %c0_i32 = arith.constant 0 : i32
    %c0_i32_0 = arith.constant 0 : i32
    return %arg0, %c0_i32 : i32, i32
  }
  func.func @transform_1(%arg0: i32) -> (i32, i32) {
    %c0_i32 = arith.constant 0 : i32
    %c0_i32_0 = arith.constant 0 : i32
    %c0_i32_1 = arith.constant 0 : i32
    return %c0_i32, %c0_i32_0 : i32, i32
  }
  func.func @transform_2(%arg0: i32) -> (i32, i32) {
    %c0_i32 = arith.constant 0 : i32
    %c0_i32_0 = arith.constant 0 : i32
    %c0_i32_1 = arith.constant 0 : i32
    return %c0_i32, %c0_i32_0 : i32, i32
  }
  func.func @transform_3(%arg0: i32) -> (i32, i32) {
    %c0_i32 = arith.constant 0 : i32
    %c0_i32_0 = arith.constant 0 : i32
    return %c0_i32, %arg0 : i32, i32
  }
}

</mosaic_0001>

<bundles_post_ra>
// kernel: tpu_custom_call.1
= control target key start
LH: loop header
LB: loop body
LE: loop exit
PB: predicated region body
PF: predicated region fallthrough
CT: control target
= control target key end

     0   :  { %8 = vsyncpa [#allocation3], 0  ;;  %s253_s0 = inlined_call_operand.hbm [shape: f32[8,32], index: 0, kind: input, shape index: {}]   ;;  %s254_s1 = inlined_call_operand.vmem [shape: f32[2,32], index: 1, kind: input, shape index: {}]   ;;  %s255_s2 = inlined_call_operand.vmem [shape: f32[2,1], index: 2, kind: input, shape index: {}]   ;;  %s256_s3 = inlined_call_operand.hbm [shape: f32[2,8], index: 3, kind: output, shape index: {}]  }
   0x1   :  { %9 = vsyncpa [#allocation4], 0  ;;  %s216_s12 = smov [#allocation2]  }
   0x2   :  { %s16_s13 = sshll.u32 %s216_s12, 4  ;;  %s17_s13 = int_to_ptr.vmem [resolvable:$true] %s16_s13 }
   0x3   :  { %s180_s14 = scalar_lea.vmem %s17_s13, 128  ;;  %p185_p1 = scmp.lt.s32.totalorder %s17_s13, %s17_s13 }
   0x4   :  { %p181_p0 = scmp.ne.s32.totalorder %s17_s13, %s180_s14  ;;  %p186_p2 = scmp.lt.s32.totalorder %s180_s14, %s180_s14 }
   0x6   :  { %p187_p3 = por %p186_p2, %p185_p1 }
   0x8   :  { %p188_p4 = pnand %p187_p3, %p181_p0 }
   0xa   :  { %191 = shalt.err (!%p188_p4)
}
   0xb   :  { %19 = dma.hbm_to_vmem [thread:$0]  %s253_s0, 128, %s17_s13, [#allocation3]  }
   0xc   :  { %212 = dma.done.wait [#allocation3], 128  }
   0xd   :  { %213 = vsyncadd [#allocation3], 4294967168  ;;  %v217_v0 = vmov 0.0   ;;  %vm218_vm0 = vmmov 0   ;;  %v219_v1 = vmov 0   ;;  %vm35_vm1 = vcmask 261120  }
   0xe   :  { %155 = vmatprep.subr.mxu0 %v217_v0  ;;  %157 = vmatprep.mubr.msk.f32.mxu0 %vm218_vm0, %v217_v0  ;;  %v27_v2 = vld [vmem:[#allocation2] sm:$0xff]  ;;  %vm125_vm2 = vcmask 1040384   ;;  %s220_s0 = smov [#allocation5]   ;;  %vm133_vm3 = vcmask 58368  }
   0xf   :  { %165 = vset.pattern.permute.xlu0 %v219_v1  ;;  %v29_v3 = vld [vmem:[%s255_s2] sm:$0x3]  ;;  %156 = vmatpush3.xpose.msk.msra.mxu0 %vm35_vm1, %v27_v2 }
  0x10   :  { %v28_v4 = vld [vmem:[%s254_s1] sm:$0x3]  ;;  %32 = vperm.xlu0 %165, %v29_v3   ;;  %s141_s1 = sshll.u32 %s220_s0, 4  ;;  %s142_s1 = int_to_ptr.vmem [resolvable:$true] %s141_s1 }
  0x11   :  { %s192_s2 = scalar_lea.vmem %s142_s1, 32  ;;  %p197_p6 = scmp.lt.s32.totalorder %s142_s1, %s142_s1 }
  0x12   :  { %158 = vmatmul.mubr.msk.f32.vlgmr.msra.gmra.mxu0 %vm35_vm1, %v28_v4  ;;  %p193_p5 = scmp.ne.s32.totalorder %s142_s1, %s192_s2  ;;  %p198_p7 = scmp.lt.s32.totalorder %s192_s2, %s192_s2 }
  0x14   :  { %p199_p8 = por %p198_p7, %p197_p6 }
  0x16   :  { %p200_p9 = pnand %p199_p8, %p193_p5 }
  0x8b   :  { %v33_v5 = vpop.permute.xlu0 %32 }
  0xd2   :  { %v108_v6 = vpop.f32.mrf.mxu0 }
  0xd3   :  { %v109_v7 = vadd.f32 %v108_v6, %v33_v5 }
  0xd4   :  { %v159_v8 = vpop.f32.mrf.mxu0 }
  0xd5   :  { %v113_v9 = vmul.f32 0.70710677, %v109_v7  ;;  %v112_v11 = vmul.f32 0.5, %v109_v7 }
  0xd7   :  { %166 = verf.f32 %v113_v9 }
  0xe4   :  { %v167_v10 = vpop.eup %166 }
  0xe5   :  { %v115_v12 = vadd.f32 1.0, %v167_v10 }
  0xe7   :  { %v116_v13 = vmul.f32 %v115_v12, %v112_v11 }
  0xe9   :  { %v118_v14 = vrot.slane %v116_v13, 1 }
  0xeb   :  { %v120_v15 = vsub.f32 %v116_v13, %v118_v14 }
  0xed   :  { %v121_v16 = vsub.f32 0.0, %v120_v15 }
  0xef   :  { %v123_v17 = vrot.slane %v121_v16, 7 }
  0xf1   :  { %v126_v18 = vsel %vm125_vm2, %v120_v15, %v123_v17 }
  0xf2   :  { %v152_v19 = vmul.f32 -1.442695, %v126_v18 }
  0xf4   :  { %168 = vpow2.f32 %v152_v19 }
 0x101   :  { %v169_v20 = vpop.eup %168 }
 0x102   :  { %v130_v21 = vadd.f32 1.0, %v169_v20 }
 0x104   :  { %170 = vrcp.f32 %v130_v21 }
 0x111   :  { %v171_v22 = vpop.eup %170 }
 0x112   :  { %134 = vst.msk [vmem:[#allocation5] sm:$0x3] %vm133_vm3, %v171_v22 }
 0x113   :  { %203 = shalt.err (!%p200_p9)
}
 0x114   :  { %144 = dma.vmem_to_hbm [thread:$0]  %s142_s1, 32, %s256_s3, [#allocation4]  }
 0x115   :  { %214 = dma.done.wait [#allocation4], 32  }
 0x116   :  { %215 = vsyncadd [#allocation4], 4294967264 }
 0x117   :  { %148 = vsyncpa [#allocation3], 1 }
 0x118   :  { %149 = vsyncpa [#allocation4], 1 }

</bundles_post_ra>
